<compile_context>
chip_gen: v6e
topology: v6e:2x2x1
jax: 0.10.0
libtpu: 0.0.40
codegen_flags: <defaults>
</compile_context>

<pallas_src>
import functools

import jax
import jax.numpy as jnp
from jax import lax
from jax.experimental import pallas as pl
from jax.experimental.pallas import tpu as pltpu

EPS = 1e-5  # InstanceNorm2d default eps


def _cell_kernel(bp_ref, x_ref, kbd_ref, ml_ref, mr_ref, gw_ref, bw_ref, w0_ref,
                 o_ref, *, W, HW, NB):
    # bp_ref : VMEM (NB, LP)    zero-padded, (h, w)-flattened input rows (row = img*C + cin)
    # x_ref  : VMEM (NB, HW)    raw input rows (skip_connect branch), lane-dense
    # kbd_ref: VMEM (9*NB, NB)  per-tap block-diagonal conv weights, 8-aligned row groups
    # ml/mr  : VMEM (1, HW)     f32 masks zeroing the w==0 / w==W-1 column wraparound
    # gw/bw  : VMEM (NB, 1)     gamma*w1 / beta*w1 (conv mix weight folded into the affine)
    # w0_ref : VMEM (1, 1)      skip-branch mix weight
    # o_ref  : VMEM (NB, HW)
    a = jnp.maximum(bp_ref[...], 0.0)   # ReLU once (commutes with the zero padding)
    ml = ml_ref[...]
    mr = mr_ref[...]

    # conv_3x3 branch: accumulate 9 taps, each a block-diagonal (NB,NB) x (NB,HW) MXU dot.
    acc = jnp.zeros((NB, HW), jnp.float32)
    for ky in range(3):
        for kx in range(3):
            t = 3 * ky + kx
            start = ky * W + kx                       # static lane shift into padded slab
            tap = a[:, start:start + HW]              # (NB, HW)
            if kx == 0:
                tap = tap * ml                        # kill row-wrap values at w == 0
            elif kx == 2:
                tap = tap * mr                        # kill row-wrap values at w == W-1
            k_t = kbd_ref[t * NB:(t + 1) * NB, :]     # (NB, NB), 8-aligned sublane slice
            acc = acc + jnp.dot(k_t, tap, preferred_element_type=jnp.float32)

    # InstanceNorm per (image, channel) row: one-pass sums, biased variance, affine folded
    # with the conv-branch mixing weight.
    inv_hw = jnp.float32(1.0 / HW)
    mean = jnp.sum(acc, axis=1, keepdims=True) * inv_hw
    sumsq = jnp.sum(acc * acc, axis=1, keepdims=True) * inv_hw
    var = jnp.maximum(sumsq - mean * mean, 0.0)
    y = (acc - mean) * lax.rsqrt(var + EPS) * gw_ref[...] + bw_ref[...]

    # MixedOp weighted sum; full (8,128)-tile store.
    o_ref[...] = (x_ref[...] * w0_ref[...] + y).astype(o_ref.dtype)


def cell_forward(x_nchw, weight, conv_w, gamma, beta):
    """x_nchw: (N, C, H, W); weight: (2,); conv_w: (C, C, 3, 3); gamma/beta: (C,)."""
    N, C, H, W = x_nchw.shape
    HW = H * W
    assert HW % 128 == 0, "lane-dense layout assumes H*W is a multiple of 128"
    LP = HW + 2 * W + 2

    # images per grid block: smallest count that fills full 8-sublane tiles.
    ipb = None
    for cand in range(1, N + 1):
        if N % cand == 0 and (cand * C) % 8 == 0:
            ipb = cand
            break
    if ipb is None:
        ipb = N  # single block; block shape equals full array (always legal)
    NB = ipb * C
    grid = (N // ipb,)

    x_f32 = x_nchw.astype(jnp.float32)
    xflat = x_f32.reshape(N * C, HW)                       # contiguous NCHW reshape, no transpose
    # One pad pass: [1 zero][W zeros][row-major data][W zeros][1 zero] per (img, chan) row,
    # so every 3x3 tap is a static in-bounds lane slice of length HW.
    bp = jnp.pad(xflat, ((0, 0), (W + 1, W + 1)))          # (N*C, LP)

    # Per-tap block-diagonal weights: kbd[t*NB + m*C + cout, m*C + cin] = conv_w[cout,cin,ky,kx].
    eye = jnp.eye(ipb, dtype=jnp.float32)
    kbd = jnp.concatenate(
        [jnp.kron(eye, conv_w[:, :, ky, kx].astype(jnp.float32))
         for ky in range(3) for kx in range(3)], axis=0)   # (9*NB, NB)

    w0 = weight[0].astype(jnp.float32).reshape(1, 1)
    w1 = weight[1].astype(jnp.float32)
    gw = jnp.tile(gamma.astype(jnp.float32) * w1, ipb).reshape(NB, 1)
    bw = jnp.tile(beta.astype(jnp.float32) * w1, ipb).reshape(NB, 1)

    # Precomputed column-boundary masks (kept out of the kernel; no in-kernel modulo).
    col = jnp.arange(HW, dtype=jnp.int32) % W
    ml = (col != 0).astype(jnp.float32).reshape(1, HW)
    mr = (col != W - 1).astype(jnp.float32).reshape(1, HW)

    kernel = functools.partial(_cell_kernel, W=W, HW=HW, NB=NB)
    out_flat = pl.pallas_call(
        kernel,
        out_shape=jax.ShapeDtypeStruct((N * C, HW), x_nchw.dtype),
        grid_spec=pltpu.PrefetchScalarGridSpec(
            num_scalar_prefetch=0,
            grid=grid,
            in_specs=[
                pl.BlockSpec((NB, LP), lambda i: (i, 0)),      # padded activations
                pl.BlockSpec((NB, HW), lambda i: (i, 0)),      # skip branch
                pl.BlockSpec((9 * NB, NB), lambda i: (0, 0)),  # block-diag conv taps
                pl.BlockSpec((1, HW), lambda i: (0, 0)),       # mask (kx == 0)
                pl.BlockSpec((1, HW), lambda i: (0, 0)),       # mask (kx == 2)
                pl.BlockSpec((NB, 1), lambda i: (0, 0)),       # gamma * w1
                pl.BlockSpec((NB, 1), lambda i: (0, 0)),       # beta * w1
                pl.BlockSpec((1, 1), lambda i: (0, 0)),        # w0
            ],
            out_specs=pl.BlockSpec((NB, HW), lambda i: (i, 0)),
        ),
        compiler_params=pltpu.CompilerParams(
            dimension_semantics=("parallel",)),
    )(bp, xflat, kbd, ml, mr, gw, bw, w0)

    return out_flat.reshape(N, C, H, W)  # pure reshape, stays NCHW


def cell_reference(x, weight, conv_w, gamma, beta):
    """Pure-JAX reference of the same forward (NCHW, like PyTorch)."""
    a = jnp.maximum(x, 0.0)
    conv = jax.lax.conv_general_dilated(
        a, conv_w, window_strides=(1, 1), padding=((1, 1), (1, 1)),
        dimension_numbers=("NCHW", "OIHW", "NCHW"))
    mean = conv.mean(axis=(2, 3), keepdims=True)
    var = ((conv - mean) ** 2).mean(axis=(2, 3), keepdims=True)
    norm = (conv - mean) * jax.lax.rsqrt(var + EPS)
    norm = norm * gamma.reshape(1, -1, 1, 1) + beta.reshape(1, -1, 1, 1)
    return x * weight[0] + norm * weight[1]


if __name__ == "__main__":
    key = jax.random.PRNGKey(0)
    k1, k2, k3, k4, k5 = jax.random.split(key, 5)
    N, C, H, W = 2, 4, 16, 16

    x = jax.random.normal(k1, (N, C, H, W), jnp.float32)
    # MixedOp architecture weights (len(OPS2D) == 2)
    weight = jax.nn.softmax(jax.random.normal(k2, (2,), jnp.float32))
    # Conv2d(c, c, 3, padding=1, bias=False) weights (MONAI ActiConvNormBlock has no conv bias)
    conv_w = 0.1 * jax.random.normal(k3, (C, C, 3, 3), jnp.float32)
    # InstanceNorm affine params
    gamma = 1.0 + 0.1 * jax.random.normal(k4, (C,), jnp.float32)
    beta = 0.1 * jax.random.normal(k5, (C,), jnp.float32)

    out = jax.block_until_ready(cell_forward(x, weight, conv_w, gamma, beta))
    ref = cell_reference(x, weight, conv_w, gamma, beta)
    max_err = float(jnp.max(jnp.abs(out - ref)))
    assert jnp.allclose(out, ref, rtol=1e-4, atol=1e-4), f"max abs err = {max_err}"
    print("KERNEL_OK")
</pallas_src>

<mosaic_0001>
module attributes {stable_mosaic.version = 11 : i64} {
  func.func @_cell_kernel(%arg0: i32, %arg1: memref<8x290xf32, #tpu.memory_space<vmem>>, %arg2: memref<8x256xf32, #tpu.memory_space<vmem>>, %arg3: memref<72x8xf32, #tpu.memory_space<vmem>>, %arg4: memref<1x256xf32, #tpu.memory_space<vmem>>, %arg5: memref<1x256xf32, #tpu.memory_space<vmem>>, %arg6: memref<8x1xf32, #tpu.memory_space<vmem>>, %arg7: memref<8x1xf32, #tpu.memory_space<vmem>>, %arg8: memref<1x1xf32, #tpu.memory_space<vmem>>, %arg9: memref<8x256xf32, #tpu.memory_space<vmem>>) attributes {dimension_semantics = [#tpu.dimension_semantics<parallel>], iteration_bounds = array<i64: 1>, scalar_prefetch = 0 : i64, scratch_operands = 0 : i64, tpu.core_type = #tpu.core_type<tc>, window_params = [{transform_indices = @transform_0, window_bounds = array<i64: 8, 290>}, {transform_indices = @transform_1, window_bounds = array<i64: 8, 256>}, {pipeline_mode = #tpu.pipeline_mode<synchronous>, transform_indices = @transform_2, window_bounds = array<i64: 72, 8>}, {pipeline_mode = #tpu.pipeline_mode<synchronous>, transform_indices = @transform_3, window_bounds = array<i64: 1, 256>}, {pipeline_mode = #tpu.pipeline_mode<synchronous>, transform_indices = @transform_4, window_bounds = array<i64: 1, 256>}, {pipeline_mode = #tpu.pipeline_mode<synchronous>, transform_indices = @transform_5, window_bounds = array<i64: 8, 1>}, {pipeline_mode = #tpu.pipeline_mode<synchronous>, transform_indices = @transform_6, window_bounds = array<i64: 8, 1>}, {pipeline_mode = #tpu.pipeline_mode<synchronous>, transform_indices = @transform_7, window_bounds = array<i64: 1, 1>}, {transform_indices = @transform_8, window_bounds = array<i64: 8, 256>}]} {
    %c0 = arith.constant 0 : index
    %c0_0 = arith.constant 0 : index
    %0 = vector.load %arg1[%c0, %c0_0] : memref<8x290xf32, #tpu.memory_space<vmem>>, vector<8x290xf32>
    %cst = arith.constant 0.000000e+00 : f32
    %1 = vector.broadcast %cst : f32 to vector<8x290xf32>
    %2 = arith.maximumf %0, %1 : vector<8x290xf32>
    %c0_1 = arith.constant 0 : index
    %c0_2 = arith.constant 0 : index
    %3 = vector.load %arg4[%c0_1, %c0_2] : memref<1x256xf32, #tpu.memory_space<vmem>>, vector<1x256xf32>
    %c0_3 = arith.constant 0 : index
    %c0_4 = arith.constant 0 : index
    %4 = vector.load %arg5[%c0_3, %c0_4] : memref<1x256xf32, #tpu.memory_space<vmem>>, vector<1x256xf32>
    %cst_5 = arith.constant 0.000000e+00 : f32
    %5 = vector.broadcast %cst_5 : f32 to vector<8x256xf32>
    %6 = vector.extract_strided_slice %2 {offsets = [0, 0], sizes = [8, 256], strides = [1, 1]} : vector<8x290xf32> to vector<8x256xf32>
    %7 = vector.broadcast %3 : vector<1x256xf32> to vector<8x256xf32>
    %8 = arith.mulf %6, %7 : vector<8x256xf32>
    %c0_6 = arith.constant 0 : index
    %c0_7 = arith.constant 0 : index
    %9 = vector.load %arg3[%c0_6, %c0_7] : memref<72x8xf32, #tpu.memory_space<vmem>>, vector<8x8xf32>
    %cst_8 = arith.constant dense<0.000000e+00> : vector<8x256xf32>
    %10 = tpu.matmul %9, %8, %cst_8 {dimension_numbers = #tpu.dot_dimension_numbers<[1], [0], [0], [1], [0, 0, 1, 1], [], []>} : vector<8x8xf32>, vector<8x256xf32>, vector<8x256xf32> -> vector<8x256xf32>
    %11 = arith.addf %5, %10 : vector<8x256xf32>
    %12 = vector.extract_strided_slice %2 {offsets = [0, 1], sizes = [8, 256], strides = [1, 1]} : vector<8x290xf32> to vector<8x256xf32>
    %c8 = arith.constant 8 : index
    %c0_9 = arith.constant 0 : index
    %13 = vector.load %arg3[%c8, %c0_9] : memref<72x8xf32, #tpu.memory_space<vmem>>, vector<8x8xf32>
    %cst_10 = arith.constant dense<0.000000e+00> : vector<8x256xf32>
    %14 = tpu.matmul %13, %12, %cst_10 {dimension_numbers = #tpu.dot_dimension_numbers<[1], [0], [0], [1], [0, 0, 1, 1], [], []>} : vector<8x8xf32>, vector<8x256xf32>, vector<8x256xf32> -> vector<8x256xf32>
    %15 = arith.addf %11, %14 : vector<8x256xf32>
    %16 = vector.extract_strided_slice %2 {offsets = [0, 2], sizes = [8, 256], strides = [1, 1]} : vector<8x290xf32> to vector<8x256xf32>
    %17 = vector.broadcast %4 : vector<1x256xf32> to vector<8x256xf32>
    %18 = arith.mulf %16, %17 : vector<8x256xf32>
    %c16 = arith.constant 16 : index
    %c0_11 = arith.constant 0 : index
    %19 = vector.load %arg3[%c16, %c0_11] : memref<72x8xf32, #tpu.memory_space<vmem>>, vector<8x8xf32>
    %cst_12 = arith.constant dense<0.000000e+00> : vector<8x256xf32>
    %20 = tpu.matmul %19, %18, %cst_12 {dimension_numbers = #tpu.dot_dimension_numbers<[1], [0], [0], [1], [0, 0, 1, 1], [], []>} : vector<8x8xf32>, vector<8x256xf32>, vector<8x256xf32> -> vector<8x256xf32>
    %21 = arith.addf %15, %20 : vector<8x256xf32>
    %22 = vector.extract_strided_slice %2 {offsets = [0, 16], sizes = [8, 256], strides = [1, 1]} : vector<8x290xf32> to vector<8x256xf32>
    %23 = vector.broadcast %3 : vector<1x256xf32> to vector<8x256xf32>
    %24 = arith.mulf %22, %23 : vector<8x256xf32>
    %c24 = arith.constant 24 : index
    %c0_13 = arith.constant 0 : index
    %25 = vector.load %arg3[%c24, %c0_13] : memref<72x8xf32, #tpu.memory_space<vmem>>, vector<8x8xf32>
    %cst_14 = arith.constant dense<0.000000e+00> : vector<8x256xf32>
    %26 = tpu.matmul %25, %24, %cst_14 {dimension_numbers = #tpu.dot_dimension_numbers<[1], [0], [0], [1], [0, 0, 1, 1], [], []>} : vector<8x8xf32>, vector<8x256xf32>, vector<8x256xf32> -> vector<8x256xf32>
    %27 = arith.addf %21, %26 : vector<8x256xf32>
    %28 = vector.extract_strided_slice %2 {offsets = [0, 17], sizes = [8, 256], strides = [1, 1]} : vector<8x290xf32> to vector<8x256xf32>
    %c32 = arith.constant 32 : index
    %c0_15 = arith.constant 0 : index
    %29 = vector.load %arg3[%c32, %c0_15] : memref<72x8xf32, #tpu.memory_space<vmem>>, vector<8x8xf32>
    %cst_16 = arith.constant dense<0.000000e+00> : vector<8x256xf32>
    %30 = tpu.matmul %29, %28, %cst_16 {dimension_numbers = #tpu.dot_dimension_numbers<[1], [0], [0], [1], [0, 0, 1, 1], [], []>} : vector<8x8xf32>, vector<8x256xf32>, vector<8x256xf32> -> vector<8x256xf32>
    %31 = arith.addf %27, %30 : vector<8x256xf32>
    %32 = vector.extract_strided_slice %2 {offsets = [0, 18], sizes = [8, 256], strides = [1, 1]} : vector<8x290xf32> to vector<8x256xf32>
    %33 = vector.broadcast %4 : vector<1x256xf32> to vector<8x256xf32>
    %34 = arith.mulf %32, %33 : vector<8x256xf32>
    %c40 = arith.constant 40 : index
    %c0_17 = arith.constant 0 : index
    %35 = vector.load %arg3[%c40, %c0_17] : memref<72x8xf32, #tpu.memory_space<vmem>>, vector<8x8xf32>
    %cst_18 = arith.constant dense<0.000000e+00> : vector<8x256xf32>
    %36 = tpu.matmul %35, %34, %cst_18 {dimension_numbers = #tpu.dot_dimension_numbers<[1], [0], [0], [1], [0, 0, 1, 1], [], []>} : vector<8x8xf32>, vector<8x256xf32>, vector<8x256xf32> -> vector<8x256xf32>
    %37 = arith.addf %31, %36 : vector<8x256xf32>
    %38 = vector.extract_strided_slice %2 {offsets = [0, 32], sizes = [8, 256], strides = [1, 1]} : vector<8x290xf32> to vector<8x256xf32>
    %39 = vector.broadcast %3 : vector<1x256xf32> to vector<8x256xf32>
    %40 = arith.mulf %38, %39 : vector<8x256xf32>
    %c48 = arith.constant 48 : index
    %c0_19 = arith.constant 0 : index
    %41 = vector.load %arg3[%c48, %c0_19] : memref<72x8xf32, #tpu.memory_space<vmem>>, vector<8x8xf32>
    %cst_20 = arith.constant dense<0.000000e+00> : vector<8x256xf32>
    %42 = tpu.matmul %41, %40, %cst_20 {dimension_numbers = #tpu.dot_dimension_numbers<[1], [0], [0], [1], [0, 0, 1, 1], [], []>} : vector<8x8xf32>, vector<8x256xf32>, vector<8x256xf32> -> vector<8x256xf32>
    %43 = arith.addf %37, %42 : vector<8x256xf32>
    %44 = vector.extract_strided_slice %2 {offsets = [0, 33], sizes = [8, 256], strides = [1, 1]} : vector<8x290xf32> to vector<8x256xf32>
    %c56 = arith.constant 56 : index
    %c0_21 = arith.constant 0 : index
    %45 = vector.load %arg3[%c56, %c0_21] : memref<72x8xf32, #tpu.memory_space<vmem>>, vector<8x8xf32>
    %cst_22 = arith.constant dense<0.000000e+00> : vector<8x256xf32>
    %46 = tpu.matmul %45, %44, %cst_22 {dimension_numbers = #tpu.dot_dimension_numbers<[1], [0], [0], [1], [0, 0, 1, 1], [], []>} : vector<8x8xf32>, vector<8x256xf32>, vector<8x256xf32> -> vector<8x256xf32>
    %47 = arith.addf %43, %46 : vector<8x256xf32>
    %48 = vector.extract_strided_slice %2 {offsets = [0, 34], sizes = [8, 256], strides = [1, 1]} : vector<8x290xf32> to vector<8x256xf32>
    %49 = vector.broadcast %4 : vector<1x256xf32> to vector<8x256xf32>
    %50 = arith.mulf %48, %49 : vector<8x256xf32>
    %c64 = arith.constant 64 : index
    %c0_23 = arith.constant 0 : index
    %51 = vector.load %arg3[%c64, %c0_23] : memref<72x8xf32, #tpu.memory_space<vmem>>, vector<8x8xf32>
    %cst_24 = arith.constant dense<0.000000e+00> : vector<8x256xf32>
    %52 = tpu.matmul %51, %50, %cst_24 {dimension_numbers = #tpu.dot_dimension_numbers<[1], [0], [0], [1], [0, 0, 1, 1], [], []>} : vector<8x8xf32>, vector<8x256xf32>, vector<8x256xf32> -> vector<8x256xf32>
    %53 = arith.addf %47, %52 : vector<8x256xf32>
    %cst_25 = arith.constant dense<0.000000e+00> : vector<8xf32>
    %54 = vector.multi_reduction <add>, %53, %cst_25 [1] : vector<8x256xf32> to vector<8xf32>
    %55 = vector.shape_cast %54 : vector<8xf32> to vector<8x1xf32>
    %cst_26 = arith.constant 3.906250e-03 : f32
    %56 = vector.broadcast %cst_26 : f32 to vector<8x1xf32>
    %57 = arith.mulf %55, %56 : vector<8x1xf32>
    %58 = arith.mulf %53, %53 : vector<8x256xf32>
    %cst_27 = arith.constant dense<0.000000e+00> : vector<8xf32>
    %59 = vector.multi_reduction <add>, %58, %cst_27 [1] : vector<8x256xf32> to vector<8xf32>
    %60 = vector.shape_cast %59 : vector<8xf32> to vector<8x1xf32>
    %cst_28 = arith.constant 3.906250e-03 : f32
    %61 = vector.broadcast %cst_28 : f32 to vector<8x1xf32>
    %62 = arith.mulf %60, %61 : vector<8x1xf32>
    %63 = arith.mulf %57, %57 : vector<8x1xf32>
    %64 = arith.subf %62, %63 : vector<8x1xf32>
    %cst_29 = arith.constant 0.000000e+00 : f32
    %65 = vector.broadcast %cst_29 : f32 to vector<8x1xf32>
    %66 = arith.maximumf %64, %65 : vector<8x1xf32>
    %67 = vector.broadcast %57 : vector<8x1xf32> to vector<8x256xf32>
    %68 = arith.subf %53, %67 : vector<8x256xf32>
    %cst_30 = arith.constant 9.99999974E-6 : f32
    %69 = vector.broadcast %cst_30 : f32 to vector<8x1xf32>
    %70 = arith.addf %66, %69 : vector<8x1xf32>
    %71 = math.rsqrt %70 : vector<8x1xf32>
    %72 = vector.broadcast %71 : vector<8x1xf32> to vector<8x256xf32>
    %73 = arith.mulf %68, %72 : vector<8x256xf32>
    %c0_31 = arith.constant 0 : index
    %c0_32 = arith.constant 0 : index
    %74 = vector.load %arg6[%c0_31, %c0_32] : memref<8x1xf32, #tpu.memory_space<vmem>>, vector<8x1xf32>
    %75 = vector.broadcast %74 : vector<8x1xf32> to vector<8x256xf32>
    %76 = arith.mulf %73, %75 : vector<8x256xf32>
    %c0_33 = arith.constant 0 : index
    %c0_34 = arith.constant 0 : index
    %77 = vector.load %arg7[%c0_33, %c0_34] : memref<8x1xf32, #tpu.memory_space<vmem>>, vector<8x1xf32>
    %78 = vector.broadcast %77 : vector<8x1xf32> to vector<8x256xf32>
    %79 = arith.addf %76, %78 : vector<8x256xf32>
    %c0_35 = arith.constant 0 : index
    %c0_36 = arith.constant 0 : index
    %80 = vector.load %arg2[%c0_35, %c0_36] : memref<8x256xf32, #tpu.memory_space<vmem>>, vector<8x256xf32>
    %c0_37 = arith.constant 0 : index
    %c0_38 = arith.constant 0 : index
    %81 = vector.load %arg8[%c0_37, %c0_38] : memref<1x1xf32, #tpu.memory_space<vmem>>, vector<1x1xf32>
    %82 = vector.broadcast %81 : vector<1x1xf32> to vector<8x256xf32>
    %83 = arith.mulf %80, %82 : vector<8x256xf32>
    %84 = arith.addf %83, %79 : vector<8x256xf32>
    %c0_39 = arith.constant 0 : index
    %c0_40 = arith.constant 0 : index
    %85 = vector.load %arg9[%c0_39, %c0_40] : memref<8x256xf32, #tpu.memory_space<vmem>>, vector<8x256xf32>
    tpu.vector_store %arg9[%c0_39, %c0_40], %84 {strides = array<i32>} : memref<8x256xf32, #tpu.memory_space<vmem>>, vector<8x256xf32>,
    return
  }
  func.func @transform_0(%arg0: i32) -> (i32, i32) {
    %c0_i32 = arith.constant 0 : i32
    %c0_i32_0 = arith.constant 0 : i32
    return %arg0, %c0_i32 : i32, i32
  }
  func.func @transform_1(%arg0: i32) -> (i32, i32) {
    %c0_i32 = arith.constant 0 : i32
    %c0_i32_0 = arith.constant 0 : i32
    return %arg0, %c0_i32 : i32, i32
  }
  func.func @transform_2(%arg0: i32) -> (i32, i32) {
    %c0_i32 = arith.constant 0 : i32
    %c0_i32_0 = arith.constant 0 : i32
    %c0_i32_1 = arith.constant 0 : i32
    return %c0_i32, %c0_i32_0 : i32, i32
  }
  func.func @transform_3(%arg0: i32) -> (i32, i32) {
    %c0_i32 = arith.constant 0 : i32
    %c0_i32_0 = arith.constant 0 : i32
    %c0_i32_1 = arith.constant 0 : i32
    return %c0_i32, %c0_i32_0 : i32, i32
  }
  func.func @transform_4(%arg0: i32) -> (i32, i32) {
    %c0_i32 = arith.constant 0 : i32
    %c0_i32_0 = arith.constant 0 : i32
    %c0_i32_1 = arith.constant 0 : i32
    return %c0_i32, %c0_i32_0 : i32, i32
  }
  func.func @transform_5(%arg0: i32) -> (i32, i32) {
    %c0_i32 = arith.constant 0 : i32
    %c0_i32_0 = arith.constant 0 : i32
    %c0_i32_1 = arith.constant 0 : i32
    return %c0_i32, %c0_i32_0 : i32, i32
  }
  func.func @transform_6(%arg0: i32) -> (i32, i32) {
    %c0_i32 = arith.constant 0 : i32
    %c0_i32_0 = arith.constant 0 : i32
    %c0_i32_1 = arith.constant 0 : i32
    return %c0_i32, %c0_i32_0 : i32, i32
  }
  func.func @transform_7(%arg0: i32) -> (i32, i32) {
    %c0_i32 = arith.constant 0 : i32
    %c0_i32_0 = arith.constant 0 : i32
    %c0_i32_1 = arith.constant 0 : i32
    return %c0_i32, %c0_i32_0 : i32, i32
  }
  func.func @transform_8(%arg0: i32) -> (i32, i32) {
    %c0_i32 = arith.constant 0 : i32
    %c0_i32_0 = arith.constant 0 : i32
    return %arg0, %c0_i32 : i32, i32
  }
}

</mosaic_0001>

<bundles_post_ra>
// kernel: tpu_custom_call.1
= control target key start
LH: loop header
LB: loop body
LE: loop exit
PB: predicated region body
PF: predicated region fallthrough
CT: control target
= control target key end

     0   :  { %s1227_s0 = inlined_call_operand.vmem [shape: f32[8,290], index: 0, kind: input, shape index: {}]   ;;  %s1228_s1 = inlined_call_operand.vmem [shape: f32[8,256], index: 1, kind: input, shape index: {}]   ;;  %s1229_s2 = inlined_call_operand.vmem [shape: f32[72,8], index: 2, kind: input, shape index: {}]   ;;  %s1230_s3 = inlined_call_operand.vmem [shape: f32[1,256], index: 3, kind: input, shape index: {}]   ;;  %s1231_s4 = inlined_call_operand.vmem [shape: f32[1,256], index: 4, kind: input, shape index: {}]   ;;  %s1232_s5 = inlined_call_operand.vmem [shape: f32[8,1], index: 5, kind: input, shape index: {}]   ;;  %s1233_s6 = inlined_call_operand.vmem [shape: f32[8,1], index: 6, kind: input, shape index: {}]   ;;  %s1234_s7 = inlined_call_operand.<no memory space> [shape: f32[1,1], index: 7, kind: input, shape index: {}]   ;;  %s1235_s8 = inlined_call_operand.hbm [shape: f32[8,256], index: 8, kind: output, shape index: {}]  }
   0x1   :  { %v13_v0 = vstv %s1234_s7 }
   0x2   :  { %14 = vst [vmem:[#allocation2] sm:$0x1] %v13_v0 }
   0x3   :  { %v41_v1 = vlaneseq  ;;  %v39_v3 = vld [vmem:[%s1231_s4] sm:$0x3] }
   0x4   :  { %v38_v4 = vld [vmem:[%s1230_s3] sm:$0x3] }
   0x5   :  { %v42_v2 = vshrl.u32 %v41_v1, 7 }
   0x6   :  { %15 = vsyncpa [#allocation4], 0  ;;  %s1037_s11 = smov 2   ;;  %s1038_s12 = smov 16   ;;  %v33_v11 = vld [vmem:[%s1227_s0 + $0x8] sm:$0xff]  ;;  %v34_v12 = vld [vmem:[%s1227_s0 + $0x10] sm:$0xff] }
   0x7   :  { %v43_v5 = vsub.s32 0, %v42_v2  ;;  %v47_v6 = vsub.s32 1, %v42_v2  ;;  %s1039_s7 = smov 18   ;;  %s1040_s4 = smov 32   ;;  %v1113_v13 = vmax.f32 %v33_v11, 0.0  ;;  %v1115_v14 = vmax.f32 %v34_v12, 0.0 }
   0x8   :  { %s1041_s16 = smov 34   ;;  %v32_v15 = vld [vmem:[%s1227_s0] sm:$0xff]  ;;  %s1042_s19 = smov 127   ;;  %v1045_v20 = vmov 0.0   ;;  %vm69_vm0 = vcmask 64512   ;;  %vm231_vm1 = vcmask 15360  }
   0x9   :  { %v222_v7 = vrot.slane %v39_v3, %v43_v5  ;;  %v44_v8 = vrot.slane %v38_v4, %v43_v5  ;;  %v226_v9 = vrot.slane %v39_v3, %v47_v6  ;;  %v48_v10 = vrot.slane %v38_v4, %v47_v6  ;;  %s1043_s20 = smov 111   ;;  %s1044_s21 = smov 95   ;;  %137 = vmatprep.mubr.f32.mxu0 %v1045_v20  ;;  %v53_v27 = vld [vmem:[%s1229_s2] sm:$0xff]  ;;  %v54_v53 = vld [vmem:[%s1229_s2 + $0x8] sm:$0xff] }
   0xa   :  { %v1122_v16 = vmax.f32 %v32_v15, 0.0  ;;  %211 = vmatprep.mubr.f32.mxu1 %v1045_v20  ;;  %s1046_s0 = smov 126   ;;  %s1047_s24 = smov 112   ;;  %vm334_vm2 = vcmask 130048   ;;  %vm64_vm3 = vcmask 1039360   ;;  %vm525_vm4 = vcmask 146432  }
   0xb   :  { %227 = vrot.lane.b32.xlu0 %v222_v7, %s1037_s11  ;;  %330 = vrot.lane.b32.xlu1 %v44_v8, %s1038_s12  ;;  %v52_v21 = vmul.f32 %v48_v10, %v1113_v13  ;;  %s1048_s25 = smov 110   ;;  %s1049_s26 = smov 96   ;;  %vm628_vm5 = vcmask 261120   ;;  %vm819_vm6 = vcmask 277504   ;;  %v1050_v54 = vmov 0   ;;  %v945_v58 = vld [vmem:[%s1233_s6] sm:$0xff] }
   0xc   :  { %v51_v24 = vmul.f32 %v44_v8, %v1122_v16  ;;  %1012 = vset.pattern.permute.xlu1 %v1050_v54  ;;  %1011 = vset.pattern.permute.xlu0 %v1050_v54  ;;  %s1051_s29 = smov 94   ;;  %vm249_vm7 = vcmask 1031168   ;;  %vm440_vm8 = vcmask 908288   ;;  %vm352_vm9 = vcmask 916480   ;;  %s1052_s23 = smov [#allocation3]  }
   0xd   :  { %177 = vmatprep.subr.mxu1 %v52_v21  ;;  %vm543_vm10 = vcmask 900096   ;;  %vm646_vm11 = vcmask 785408   ;;  %vm734_vm12 = vcmask 777216   ;;  %vm837_vm13 = vcmask 769024  }
   0xe   :  { %178 = vmatpush1.msra.mxu1 %v51_v24 }
   0xf   :  { %229 = vrot.lane.b32.xlu0 %v226_v9, %s1037_s11  ;;  %332 = vrot.lane.b32.xlu1 %v48_v10, %s1038_s12 }
  0x10   :  { %986 = vmatmul.mubr.msk.f32.vlgmr.msra.gmra.mxu1 %vm69_vm0, %v53_v27 }
  0x11   :  { %424 = vmatprep.mubr.f32.mxu1 %v1045_v20 }
  0x13   :  { %521 = vrot.lane.b32.xlu0 %v222_v7, %s1039_s7  ;;  %523 = vrot.lane.b32.xlu1 %v226_v9, %s1039_s7 }
  0x17   :  { %624 = vrot.lane.b32.xlu0 %v44_v8, %s1040_s4  ;;  %626 = vrot.lane.b32.xlu1 %v48_v10, %s1040_s4  ;;  %v239_v10 = vld [vmem:[%s1229_s2 + $0x10] sm:$0xff] }
  0x1b   :  { %815 = vrot.lane.b32.xlu0 %v222_v7, %s1041_s16  ;;  %817 = vrot.lane.b32.xlu1 %v226_v9, %s1041_s16 }
  0x1f   :  { %60 = vrot.lane.b32.xlu0 %v1113_v13, %s1042_s19  ;;  %62 = vrot.lane.b32.xlu1 %v1115_v14, %s1042_s19 }
  0x23   :  { %58 = vrot.lane.b32.xlu0 %v1122_v16, %s1042_s19  ;;  %436 = vrot.lane.b32.xlu1 %v1113_v13, %s1043_s20 }
  0x27   :  { %434 = vrot.lane.b32.xlu1 %v1122_v16, %s1043_s20  ;;  %438 = vrot.lane.b32.xlu0 %v1115_v14, %s1043_s20 }
  0x2b   :  { %730 = vrot.lane.b32.xlu0 %v1113_v13, %s1044_s21 }
  0x7d   :  { %v228_v17 = vpop.permute.xlu0 %227  ;;  %v331_v18 = vpop.permute.xlu1 %330 }
  0x7e   :  { %v236_v19 = vmul.f32 %v228_v17, %v1122_v16  ;;  %v339_v30 = vmul.f32 %v331_v18, %v1122_v16 }
  0x80   :  { %243 = vrot.lane.b32.xlu1 %v236_v19, %s1046_s0 }
  0x81   :  { %v230_v22 = vpop.permute.xlu0 %229  ;;  %v333_v23 = vpop.permute.xlu1 %332 }
  0x82   :  { %v238_v25 = vmul.f32 %v230_v22, %v1115_v14  ;;  %v341_v26 = vmul.f32 %v333_v23, %v1115_v14  ;;  %v232_v36 = vsel %vm231_vm1, %v228_v17, %v230_v22  ;;  %v335_v41 = vsel %vm334_vm2, %v331_v18, %v333_v23  ;;  %v342_v17 = vld [vmem:[%s1229_s2 + $0x18] sm:$0xff]  ;;  %v433_v18 = vld [vmem:[%s1229_s2 + $0x20] sm:$0xff] }
  0x83   :  { %v237_v40 = vmul.f32 %v232_v36, %v1113_v13  ;;  %v340_v44 = vmul.f32 %v335_v41, %v1113_v13 }
  0x84   :  { %247 = vrot.lane.b32.xlu0 %v238_v25, %s1046_s0  ;;  %350 = vrot.lane.b32.xlu1 %v341_v26, %s1047_s24  ;;  %v533_v26 = vld [vmem:[%s1229_s2 + $0x28] sm:$0xff] }
  0x85   :  { %v522_v28 = vpop.permute.xlu0 %521  ;;  %v524_v29 = vpop.permute.xlu1 %523 }
  0x86   :  { %v532_v31 = vmul.f32 %v524_v29, %v1115_v14  ;;  %v530_v34 = vmul.f32 %v522_v28, %v1122_v16  ;;  %v526_v46 = vsel %vm525_vm4, %v522_v28, %v524_v29  ;;  %v636_v28 = vld [vmem:[%s1229_s2 + $0x30] sm:$0xff] }
  0x87   :  { %v531_v50 = vmul.f32 %v526_v46, %v1113_v13 }
  0x88   :  { %346 = vrot.lane.b32.xlu0 %v339_v30, %s1047_s24  ;;  %541 = vrot.lane.b32.xlu1 %v532_v31, %s1048_s25 }
  0x89   :  { %v625_v32 = vpop.permute.xlu0 %624  ;;  %v627_v33 = vpop.permute.xlu1 %626 }
  0x8a   :  { %v633_v35 = vmul.f32 %v625_v32, %v1122_v16  ;;  %v635_v37 = vmul.f32 %v627_v33, %v1115_v14  ;;  %v629_v47 = vsel %vm628_vm5, %v625_v32, %v627_v33  ;;  %v727_v32 = vld [vmem:[%s1229_s2 + $0x38] sm:$0xff] }
  0x8b   :  { %v634_v51 = vmul.f32 %v629_v47, %v1113_v13 }
  0x8c   :  { %537 = vrot.lane.b32.xlu0 %v530_v34, %s1048_s25  ;;  %640 = vrot.lane.b32.xlu1 %v633_v35, %s1049_s26 }
  0x8d   :  { %v816_v38 = vpop.permute.xlu0 %815  ;;  %v818_v39 = vpop.permute.xlu1 %817 }
  0x8e   :  { %v820_v48 = vsel %vm819_vm6, %v816_v38, %v818_v39  ;;  %v824_v56 = vmul.f32 %v816_v38, %v1122_v16  ;;  %v826_v57 = vmul.f32 %v818_v39, %v1115_v14 }
  0x8f   :  { %v825_v55 = vmul.f32 %v820_v48, %v1113_v13 }
  0x90   :  { %644 = vrot.lane.b32.xlu0 %v635_v37, %s1049_s26  ;;  %245 = vrot.lane.b32.xlu1 %v237_v40, %s1046_s0  ;;  %v827_v37 = vld [vmem:[%s1229_s2 + $0x40] sm:$0xff] }
  0x91   :  { %v61_v42 = vpop.permute.xlu0 %60  ;;  %v63_v43 = vpop.permute.xlu1 %62 }
  0x92   :  { %v66_v45 = vsel %vm64_vm3, %v61_v42, %v63_v43 }
  0x93   :  { %103 = vmatprep.subr.mxu0 %v66_v45 }
  0x94   :  { %348 = vrot.lane.b32.xlu0 %v340_v44, %s1047_s24  ;;  %732 = vrot.lane.b32.xlu1 %v1115_v14, %s1044_s21  ;;  %s977_s24 = sshll.u32 %s1052_s23, 4  ;;  %s978_s24 = int_to_ptr.vmem [resolvable:$true] %s977_s24 }
  0x95   :  { %v59_v49 = vpop.permute.xlu0 %58  ;;  %v437_v59 = vpop.permute.xlu1 %436  ;;  %p1020_p1 = scmp.lt.s32.totalorder %s978_s24, %s978_s24 }
  0x96   :  { %v65_v52 = vsel %vm64_vm3, %v59_v49, %v61_v42 }
  0x97   :  { %104 = vmatpush1.msra.mxu0 %v65_v52 }
  0x98   :  { %539 = vrot.lane.b32.xlu0 %v531_v50, %s1048_s25  ;;  %642 = vrot.lane.b32.xlu1 %v634_v51, %s1049_s26  ;;  %s1015_s25 = scalar_lea.vmem %s978_s24, 256 }
  0x99   :  { %985 = vmatmul.mubr.msk.f32.vlgmr.msra.gmra.mxu0 %vm69_vm0, %v54_v53  ;;  %v439_v60 = vpop.permute.xlu0 %438  ;;  %v435_v61 = vpop.permute.xlu1 %434  ;;  %p1016_p0 = scmp.ne.s32.totalorder %s978_s24, %s1015_s25  ;;  %p1021_p2 = scmp.lt.s32.totalorder %s1015_s25, %s1015_s25 }
  0x9a   :  { %321 = vmatprep.mubr.f32.mxu0 %v1045_v20  ;;  %v442_v11 = vsel %vm440_vm8, %v437_v59, %v439_v60  ;;  %v441_v12 = vsel %vm440_vm8, %v435_v61, %v437_v59 }
  0x9b   :  { %p1022_p3 = por %p1021_p2, %p1020_p1 }
  0x9c   :  { %728 = vrot.lane.b32.xlu0 %v1122_v16, %s1044_s21  ;;  %833 = vrot.lane.b32.xlu1 %v825_v55, %s1051_s29 }
  0x9d   :  { %v731_v62 = vpop.permute.xlu0 %730  ;;  %p1023_p4 = pnand %p1022_p3, %p1016_p0 }
  0xa0   :  { %835 = vrot.lane.b32.xlu0 %v826_v57, %s1051_s29  ;;  %831 = vrot.lane.b32.xlu1 %v824_v56, %s1051_s29 }
  0xa4   :  { %948 = vperm.xlu1 %1012, %v945_v58  }
  0xd0   :  { %v213_v39 = vpop.f32.mrf.mxu1 }
  0xd2   :  { %v215_v42 = vpop.f32.mrf.mxu1 }
  0xf2   :  { %v244_v63 = vpop.permute.xlu1 %243 }
  0xf6   :  { %v248_v0 = vpop.permute.xlu0 %247  ;;  %v351_v1 = vpop.permute.xlu1 %350 }
  0xfa   :  { %v347_v2 = vpop.permute.xlu0 %346  ;;  %v542_v3 = vpop.permute.xlu1 %541 }
  0xfe   :  { %v538_v4 = vpop.permute.xlu0 %537  ;;  %v641_v5 = vpop.permute.xlu1 %640 }
 0x102   :  { %v645_v6 = vpop.permute.xlu0 %644  ;;  %v246_v7 = vpop.permute.xlu1 %245 }
 0x103   :  { %v250_v8 = vsel %vm249_vm7, %v244_v63, %v246_v7  ;;  %v251_v9 = vsel %vm249_vm7, %v246_v7, %v248_v0 }
 0x104   :  { %287 = vmatprep.subr.mxu0 %v251_v9 }
 0x105   :  { %288 = vmatpush1.msra.mxu0 %v250_v8 }
 0x106   :  { %v349_v13 = vpop.permute.xlu0 %348  ;;  %478 = vmatprep.subr.mxu0 %v442_v11  ;;  %v733_v14 = vpop.permute.xlu1 %732  ;;  %987 = vmatmul.mubr.msk.f32.vlgmr.msra.gmra.mxu0 %vm69_vm0, %v239_v10  ;;  %v994_v11 = vld [vmem:[#allocation2] ss:$0 sm:$0xff] }
 0x107   :  { %v353_v15 = vsel %vm352_vm9, %v347_v2, %v349_v13  ;;  %479 = vmatpush1.msra.mxu0 %v441_v12  ;;  %v354_v16 = vsel %vm352_vm9, %v349_v13, %v351_v1  ;;  %512 = vmatprep.mubr.f32.mxu0 %v1045_v20  ;;  %v736_v27 = vsel %vm734_vm12, %v731_v62, %v733_v14  ;;  %v937_v12 = vld [vmem:[%s1232_s5] sm:$0xff] }
 0x108   :  { %390 = vmatprep.subr.mxu1 %v354_v16 }
 0x109   :  { %391 = vmatpush1.msra.mxu1 %v353_v15 }
 0x10a   :  { %v540_v19 = vpop.permute.xlu0 %539  ;;  %v643_v21 = vpop.permute.xlu1 %642  ;;  %988 = vmatmul.mubr.msk.f32.vlgmr.msra.gmra.mxu1 %vm69_vm0, %v342_v17  ;;  %989 = vmatmul.mubr.msk.f32.vlgmr.msra.gmra.mxu0 %vm69_vm0, %v433_v18 }
 0x10b   :  { %v544_v22 = vsel %vm543_vm10, %v538_v4, %v540_v19  ;;  %v647_v23 = vsel %vm646_vm11, %v641_v5, %v643_v21  ;;  %v545_v24 = vsel %vm543_vm10, %v540_v19, %v542_v3  ;;  %v648_v25 = vsel %vm646_vm11, %v643_v21, %v645_v6  ;;  %615 = vmatprep.mubr.f32.mxu1 %v1045_v20 }
 0x10c   :  { %581 = vmatprep.subr.mxu1 %v545_v24  ;;  %684 = vmatprep.subr.mxu0 %v648_v25 }
 0x10d   :  { %582 = vmatpush1.msra.mxu1 %v544_v22  ;;  %685 = vmatpush1.msra.mxu0 %v647_v23 }
 0x10e   :  { %v729_v29 = vpop.permute.xlu0 %728  ;;  %v834_v30 = vpop.permute.xlu1 %833  ;;  %772 = vmatprep.subr.mxu1 %v736_v27  ;;  %990 = vmatmul.mubr.msk.f32.vlgmr.msra.gmra.mxu1 %vm69_vm0, %v533_v26 }
 0x10f   :  { %v735_v31 = vsel %vm734_vm12, %v729_v29, %v731_v62  ;;  %718 = vmatprep.mubr.f32.mxu0 %v1045_v20  ;;  %806 = vmatprep.mubr.f32.mxu1 %v1045_v20  ;;  %v953_v29 = vld [vmem:[%s1228_s1] sm:$0xff] }
 0x110   :  { %773 = vmatpush1.msra.mxu1 %v735_v31  ;;  %991 = vmatmul.mubr.msk.f32.vlgmr.msra.gmra.mxu0 %vm69_vm0, %v636_v28 }
 0x111   :  { %909 = vmatprep.mubr.f32.mxu0 %v1045_v20 }
 0x112   :  { %v836_v33 = vpop.permute.xlu0 %835  ;;  %v832_v34 = vpop.permute.xlu1 %831  ;;  %992 = vmatmul.mubr.msk.f32.vlgmr.msra.gmra.mxu1 %vm69_vm0, %v727_v32 }
 0x113   :  { %v838_v35 = vsel %vm837_vm13, %v832_v34, %v834_v30  ;;  %v839_v36 = vsel %vm837_vm13, %v834_v30, %v836_v33  ;;  %v954_v30 = vld [vmem:[%s1228_s1 + $0x8] sm:$0xff] }
 0x114   :  { %875 = vmatprep.subr.mxu0 %v839_v36 }
 0x115   :  { %876 = vmatpush1.msra.mxu0 %v838_v35 }
 0x116   :  { %993 = vmatmul.mubr.msk.f32.vlgmr.msra.gmra.mxu0 %vm69_vm0, %v827_v37 }
 0x11f   :  { %v949_v13 = vpop.permute.xlu1 %948 }
 0x159   :  { %v139_v38 = vpop.f32.mrf.mxu0 }
 0x15a   :  { %v214_v41 = vadd.f32 %v213_v39, %v139_v38 }
 0x15b   :  { %v141_v40 = vpop.f32.mrf.mxu0 }
 0x15c   :  { %v216_v43 = vadd.f32 %v215_v42, %v141_v40 }
 0x1c6   :  { %v323_v20 = vpop.f32.mrf.mxu0 }
 0x1c7   :  { %v328_v44 = vadd.f32 %v323_v20, %v214_v41 }
 0x1c8   :  { %v325_v45 = vpop.f32.mrf.mxu0 }
 0x1c9   :  { %v329_v48 = vadd.f32 %v325_v45, %v216_v43 }
 0x1ca   :  { %v426_v46 = vpop.f32.mrf.mxu1  ;;  %v514_v47 = vpop.f32.mrf.mxu0 }
 0x1cb   :  { %v431_v49 = vadd.f32 %v426_v46, %v328_v44 }
 0x1cc   :  { %v428_v50 = vpop.f32.mrf.mxu1  ;;  %v516_v51 = vpop.f32.mrf.mxu0 }
 0x1cd   :  { %v432_v52 = vadd.f32 %v428_v50, %v329_v48  ;;  %v519_v53 = vadd.f32 %v514_v47, %v431_v49 }
 0x1ce   :  { %v617_v54 = vpop.f32.mrf.mxu1 }
 0x1cf   :  { %v520_v55 = vadd.f32 %v516_v51, %v432_v52  ;;  %v622_v56 = vadd.f32 %v617_v54, %v519_v53 }
 0x1d0   :  { %v619_v57 = vpop.f32.mrf.mxu1  ;;  %v720_v58 = vpop.f32.mrf.mxu0 }
 0x1d1   :  { %v623_v59 = vadd.f32 %v619_v57, %v520_v55  ;;  %v725_v60 = vadd.f32 %v720_v58, %v622_v56 }
 0x1d2   :  { %v722_v61 = vpop.f32.mrf.mxu0  ;;  %v808_v62 = vpop.f32.mrf.mxu1 }
 0x1d3   :  { %v726_v63 = vadd.f32 %v722_v61, %v623_v59  ;;  %v813_v1 = vadd.f32 %v808_v62, %v725_v60 }
 0x1d4   :  { %v810_v0 = vpop.f32.mrf.mxu1 }
 0x1d5   :  { %v814_v3 = vadd.f32 %v810_v0, %v726_v63 }
 0x1d6   :  { %v911_v2 = vpop.f32.mrf.mxu0 }
 0x1d7   :  { %v916_v4 = vadd.f32 %v911_v2, %v813_v1 }
 0x1d8   :  { %v913_v5 = vpop.f32.mrf.mxu0 }
 0x1d9   :  { %v917_v6 = vadd.f32 %v913_v5, %v814_v3  ;;  %v922_v8 = vmul.f32 %v916_v4, %v916_v4 }
 0x1db   :  { %v918_v7 = vadd.f32 %v917_v6, %v916_v4  ;;  %v923_v9 = vmul.f32 %v917_v6, %v917_v6 }
 0x1dd   :  { %919 = vadd.xlane.f32.xlu0 %v918_v7  ;;  %v924_v10 = vadd.f32 %v923_v9, %v922_v8 }
 0x1df   :  { %925 = vadd.xlane.f32.xlu1 %v924_v10 }
 0x1f0   :  { %962 = vperm.xlu1 %1012, %v994_v11  }
 0x1f3   :  { %940 = vperm.xlu0 %1011, %v937_v12  }
 0x266   :  { %v920_v14 = vpop.xlane.xlu0 %919 }
 0x267   :  { %v921_v15 = vmul.f32 0.00390625, %v920_v14 }
 0x268   :  { %v926_v16 = vpop.xlane.xlu1 %925 }
 0x269   :  { %v927_v17 = vmul.f32 0.00390625, %v926_v16  ;;  %v928_v18 = vmul.f32 %v921_v15, %v921_v15  ;;  %v931_v23 = vsub.f32 %v916_v4, %v921_v15  ;;  %v932_v24 = vsub.f32 %v917_v6, %v921_v15 }
 0x26b   :  { %v929_v19 = vsub.f32 %v927_v17, %v928_v18 }
 0x26c   :  { %v963_v31 = vpop.permute.xlu1 %962 }
 0x26d   :  { %v930_v21 = vmax.f32 %v929_v19, 0.0  ;;  %v965_v34 = vmul.f32 %v963_v31, %v953_v29  ;;  %v966_v35 = vmul.f32 %v963_v31, %v954_v30 }
 0x26e   :  { %v941_v26 = vpop.permute.xlu0 %940 }
 0x26f   :  { %v933_v22 = vadd.f32 1e-05, %v930_v21 }
 0x271   :  { %1013 = vrsqrt.f32 %v933_v22 }
 0x27e   :  { %v1014_v25 = vpop.eup %1013 }
 0x27f   :  { %v935_v27 = vmul.f32 %v1014_v25, %v931_v23  ;;  %v936_v28 = vmul.f32 %v1014_v25, %v932_v24 }
 0x281   :  { %v943_v32 = vmul.f32 %v941_v26, %v935_v27  ;;  %v944_v33 = vmul.f32 %v941_v26, %v936_v28 }
 0x283   :  { %v951_v36 = vadd.f32 %v949_v13, %v943_v32  ;;  %v952_v37 = vadd.f32 %v949_v13, %v944_v33 }
 0x285   :  { %v967_v38 = vadd.f32 %v965_v34, %v951_v36  ;;  %v968_v39 = vadd.f32 %v966_v35, %v952_v37 }
 0x287   :  { %969 = vst [vmem:[#allocation3] sm:$0xff] %v967_v38  ;;  %970 = vst [vmem:[#allocation3 + $0x8] sm:$0xff] %v968_v39 }
 0x288   :  { %1026 = shalt.err (!%p1023_p4)
}
 0x289   :  { %980 = dma.vmem_to_hbm [thread:$0]  %s978_s24, 256, %s1235_s8, [#allocation4]  }
 0x28a   :  { %1035 = dma.done.wait [#allocation4], 256  }
 0x28b   :  { %1036 = vsyncadd [#allocation4], 4294967040 }
 0x28c   :  { %984 = vsyncpa [#allocation4], 1 }

</bundles_post_ra>
